<compile_context>
chip_gen: v7x
topology: tpu7x:2x2x1
jax: 0.10.0
libtpu: 0.0.40
codegen_flags: <defaults>
</compile_context>

<pallas_src>
import jax
import jax.numpy as jnp
from jax.experimental import pallas as pl
from jax.experimental.pallas import tpu as pltpu

BN_EPS = 1e-5
N_ID_LAYERS = 6
HID = 64          # identity-module hidden channels
IN_F = 28 * 28    # 784
F1 = 128          # fc1 width
PAD = 128         # lane-dense padded width for fc2 / identity / fc3 outputs
OUT_F = 10


def _round_up(x, m):
    return -(-x // m) * m


def simplenet_kernel(x_ref, w1_ref, w2_ref, wid_ref, w3_ref, b_ref, out_ref):
    """Generic path (trained identity-module weights).

    x_ref  : (tb, 784)  bf16
    w1_ref : (784, 128) bf16   fc1 weight
    w2_ref : (128, 128) bf16   fc2 weight, cols 64..127 zero-padded
    wid_ref: (128, 128) bf16   folded identity stack (+ residual I), block-diagonal
    w3_ref : (128, 128) bf16   fc3 weight, rows 64.. and cols 10.. zero-padded
    b_ref  : (8, 128)   f32    rows 0..3 = [b1, b2_pad, b_id_pad, b3_pad]
    out_ref: (tb, 128)  bf16   cols 0..9 hold the logits
    """
    b = b_ref[...]

    # fc1 + relu : native bf16 MXU, f32 accumulate; relu/bias stay f32 on the VPU.
    h = jnp.dot(x_ref[...], w1_ref[...],
                preferred_element_type=jnp.float32) + b[0:1, :]
    h = jnp.maximum(h, 0.0)                                    # (tb, 128) f32

    # fc2 + relu (output padded 64 -> 128; padded lanes stay exactly zero)
    h = jnp.dot(h.astype(jnp.bfloat16), w2_ref[...],
                preferred_element_type=jnp.float32) + b[1:2, :]
    h = jnp.maximum(h, 0.0)                                    # (tb, 128) f32

    # identity module: 6x (zero-conv center tap + eval BN) + residual, folded
    # host-side into one affine map -> one MXU pass; then the final relu.
    z = jnp.dot(h.astype(jnp.bfloat16), wid_ref[...],
                preferred_element_type=jnp.float32) + b[2:3, :]
    z = jnp.maximum(z, 0.0)                                    # (tb, 128) f32

    # fc3 (padded 10 -> 128: unmasked full-lane store), bf16 writeback
    out_ref[...] = (jnp.dot(z.astype(jnp.bfloat16), w3_ref[...],
                            preferred_element_type=jnp.float32)
                    + b[3:4, :]).astype(out_ref.dtype)


def simplenet_kernel_idskip(x_ref, w1_ref, w2_ref, w3_ref, b_ref, out_ref):
    """Zero-init fast path: folded identity map == I, so the wid matmul collapses
    to a VPU bias add (saves one tb x 128 x 128 MXU pass per tile)."""
    b = b_ref[...]

    h = jnp.dot(x_ref[...], w1_ref[...],
                preferred_element_type=jnp.float32) + b[0:1, :]
    h = jnp.maximum(h, 0.0)

    h = jnp.dot(h.astype(jnp.bfloat16), w2_ref[...],
                preferred_element_type=jnp.float32) + b[1:2, :]
    h = jnp.maximum(h, 0.0)

    z = jnp.maximum(h + b[2:3, :], 0.0)                        # identity stack folded to bias

    out_ref[...] = (jnp.dot(z.astype(jnp.bfloat16), w3_ref[...],
                            preferred_element_type=jnp.float32)
                    + b[3:4, :]).astype(out_ref.dtype)


def simplenet_forward(x, packed, *, tile_b=1024):
    """x: (B, 1, 28, 28) (or (B, 784)).  Returns (B, 10) f32 logits."""
    B = x.shape[0]
    x2d = x.reshape(B, IN_F).astype(jnp.bfloat16)   # bf16 input DMA (dominant HBM bytes)

    Bp0 = _round_up(B, 8)
    tb = min(tile_b, Bp0)
    if B >= 16:
        # >= 2 grid steps so ("parallel",) semantics can shard across both v7x TCs
        tb = min(tb, _round_up(-(-Bp0 // 2), 8))
    tb = _round_up(tb, 8)
    Bp = _round_up(Bp0, tb)
    if Bp != B:
        x2d = jnp.pad(x2d, ((0, Bp - B), (0, 0)))
    grid = (Bp // tb,)

    def const_spec(shape):
        # constant index_map -> block never changes -> stays VMEM-resident across steps
        return pl.BlockSpec(shape, lambda i: (0, 0))

    if packed["id_is_identity"]:
        kernel = simplenet_kernel_idskip
        weights = (packed["w1"], packed["w2p"], packed["w3p"], packed["bias"])
        w_specs = [const_spec((IN_F, F1)), const_spec((F1, PAD)),
                   const_spec((PAD, PAD)), const_spec((8, PAD))]
    else:
        kernel = simplenet_kernel
        weights = (packed["w1"], packed["w2p"], packed["widp"], packed["w3p"],
                   packed["bias"])
        w_specs = [const_spec((IN_F, F1)), const_spec((F1, PAD)),
                   const_spec((PAD, PAD)), const_spec((PAD, PAD)),
                   const_spec((8, PAD))]

    out = pl.pallas_call(
        kernel,
        out_shape=jax.ShapeDtypeStruct((Bp, PAD), jnp.bfloat16),
        grid=grid,
        in_specs=[pl.BlockSpec((tb, IN_F), lambda i: (i, 0))] + w_specs,
        out_specs=pl.BlockSpec((tb, PAD), lambda i: (i, 0)),
        compiler_params=pltpu.CompilerParams(
            dimension_semantics=("parallel",)),
    )(x2d, *weights)
    return out[:B, :OUT_F].astype(jnp.float32)


def init_params(key):
    """Raw parameters mirroring PyTorch's default inits (eval-mode BN buffers)."""
    ks = jax.random.split(key, 7)

    def linear(kw, kb, fan_in, fan_out):
        bound = 1.0 / jnp.sqrt(jnp.float32(fan_in))
        w = jax.random.uniform(kw, (fan_in, fan_out), jnp.float32, -bound, bound)
        b = jax.random.uniform(kb, (1, fan_out), jnp.float32, -bound, bound)
        return w, b

    w1, b1 = linear(ks[0], ks[1], IN_F, F1)
    w2, b2 = linear(ks[2], ks[3], F1, HID)
    w3, b3 = linear(ks[4], ks[5], HID, OUT_F)

    # w1/w2 stored bf16 (native MXU operand dtype); the reference upcasts the same
    # stored values to f32, so the weight-side quantization is shared.
    w1 = w1.astype(jnp.bfloat16)
    w2 = w2.astype(jnp.bfloat16)

    # ZeroConvBatchNorm: conv weight zero-filled in __init__; conv bias keeps the
    # default PyTorch uniform(-1/sqrt(C*3*3), ...).  BN affine/buffers are defaults.
    # cw is stored in (in, out) orientation (z @ cw[l]); zero-init so orientation is moot.
    cw = jnp.zeros((N_ID_LAYERS, HID, HID), jnp.float32)        # 3x3 center taps
    cbound = 1.0 / jnp.sqrt(jnp.float32(HID * 3 * 3))
    cb = jax.random.uniform(ks[6], (N_ID_LAYERS, 1, HID), jnp.float32, -cbound, cbound)
    gamma = jnp.ones((N_ID_LAYERS, 1, HID), jnp.float32)
    beta = jnp.zeros((N_ID_LAYERS, 1, HID), jnp.float32)
    rm = jnp.zeros((N_ID_LAYERS, 1, HID), jnp.float32)
    rv = jnp.ones((N_ID_LAYERS, 1, HID), jnp.float32)

    return dict(w1=w1, b1=b1, w2=w2, b2=b2, w3=w3, b3=b3,
                cw=cw, cb=cb, gamma=gamma, beta=beta, rm=rm, rv=rv)


def pack_params(p):
    """Host-side algebra: fold eval-BN into each layer, compose the 6 affine layers
    (+ residual) into one (64,64) map, pad lane-dense, pack biases, detect the
    zero-init degenerate case (folded map == I)."""
    scale = p["gamma"] / jnp.sqrt(p["rv"] + BN_EPS)             # (6,1,64)
    wl = p["cw"] * scale                                        # scale output channels
    bl = (p["cb"] - p["rm"]) * scale + p["beta"]                # (6,1,64)

    w_tot = jnp.eye(HID, dtype=jnp.float32)
    b_tot = jnp.zeros((1, HID), jnp.float32)
    for l in range(N_ID_LAYERS):                                # compose z -> z@W + b
        w_tot = w_tot @ wl[l]
        b_tot = b_tot @ wl[l] + bl[l]
    w_id = w_tot + jnp.eye(HID, dtype=jnp.float32)              # residual folded in

    # zero-init conv weights => w_tot == 0 => folded map is exactly the identity
    id_is_identity = bool(jnp.all(w_id == jnp.eye(HID, dtype=jnp.float32)))

    # lane-dense zero-padding to 128-wide, all matmul operands bf16
    w2p = jnp.zeros((F1, PAD), jnp.bfloat16).at[:, :HID].set(p["w2"])
    widp = jnp.zeros((PAD, PAD), jnp.bfloat16).at[:HID, :HID].set(
        w_id.astype(jnp.bfloat16))
    w3p = jnp.zeros((PAD, PAD), jnp.bfloat16).at[:HID, :OUT_F].set(
        p["w3"].astype(jnp.bfloat16))

    bias = jnp.zeros((8, PAD), jnp.float32)
    bias = bias.at[0, :F1].set(p["b1"][0])
    bias = bias.at[1, :HID].set(p["b2"][0])
    bias = bias.at[2, :HID].set(b_tot[0])
    bias = bias.at[3, :OUT_F].set(p["b3"][0])

    return dict(w1=p["w1"], w2p=w2p, widp=widp, w3p=w3p, bias=bias,
                id_is_identity=id_is_identity)


def reference_forward(x, p):
    """Pure-JAX reference mirroring the PyTorch forward layer by layer (eval BN)."""
    B = x.shape[0]
    h = x.reshape(B, IN_F).astype(jnp.float32)
    h = jax.nn.relu(h @ p["w1"].astype(jnp.float32) + p["b1"])
    h = jax.nn.relu(h @ p["w2"].astype(jnp.float32) + p["b2"])
    z = h
    for l in range(N_ID_LAYERS):
        z = z @ p["cw"][l] + p["cb"][l]
        z = (z - p["rm"][l]) / jnp.sqrt(p["rv"][l] + BN_EPS) * p["gamma"][l] + p["beta"][l]
    z = jax.nn.relu(z + h)
    return z @ p["w3"] + p["b3"]


def _check(x, raw, tag):
    packed = pack_params(raw)
    out = jax.block_until_ready(simplenet_forward(x, packed))
    ref = reference_forward(x, raw)
    assert out.shape == (x.shape[0], OUT_F) and out.dtype == jnp.float32
    # bf16 activations / bf16 output vs f32 reference -> loosened tolerance
    assert jnp.allclose(out, ref, atol=3e-2, rtol=3e-2), (
        tag + ": Pallas kernel mismatch vs reference: max|diff|="
        + str(float(jnp.max(jnp.abs(out - ref)))))
    return packed


if __name__ == "__main__":
    key = jax.random.PRNGKey(0)
    pkey, xkey, wkey = jax.random.split(key, 3)
    raw = init_params(pkey)
    x = jax.random.normal(xkey, (8, 1, 28, 28), jnp.float32)    # small MNIST-like batch

    # 1) as-initialized network: zero-conv identity stack -> fast (matmul-skip) path
    packed0 = _check(x, raw, "zero-init")
    assert packed0["id_is_identity"]

    # 2) perturbed identity-module weights: exercise the generic folded-matmul path
    raw2 = dict(raw)
    raw2["cw"] = 0.05 * jax.random.normal(wkey, raw["cw"].shape, jnp.float32)
    packed1 = _check(x, raw2, "perturbed")
    assert not packed1["id_is_identity"]

    print("KERNEL_OK")
</pallas_src>

<mosaic_0001>
module attributes {stable_mosaic.version = 11 : i64} {
  func.func @simplenet_kernel_idskip(%arg0: i32, %arg1: memref<8x784xbf16, #tpu.memory_space<vmem>>, %arg2: memref<784x128xbf16, #tpu.memory_space<vmem>>, %arg3: memref<128x128xbf16, #tpu.memory_space<vmem>>, %arg4: memref<128x128xbf16, #tpu.memory_space<vmem>>, %arg5: memref<8x128xf32, #tpu.memory_space<vmem>>, %arg6: memref<8x128xbf16, #tpu.memory_space<vmem>>) attributes {dimension_semantics = [#tpu.dimension_semantics<parallel>], iteration_bounds = array<i64: 1>, scalar_prefetch = 0 : i64, scratch_operands = 0 : i64, tpu.core_type = #tpu.core_type<tc>, window_params = [{transform_indices = @transform_0, window_bounds = array<i64: 8, 784>}, {pipeline_mode = #tpu.pipeline_mode<synchronous>, transform_indices = @transform_1, window_bounds = array<i64: 784, 128>}, {pipeline_mode = #tpu.pipeline_mode<synchronous>, transform_indices = @transform_2, window_bounds = array<i64: 128, 128>}, {pipeline_mode = #tpu.pipeline_mode<synchronous>, transform_indices = @transform_3, window_bounds = array<i64: 128, 128>}, {pipeline_mode = #tpu.pipeline_mode<synchronous>, transform_indices = @transform_4, window_bounds = array<i64: 8, 128>}, {transform_indices = @transform_5, window_bounds = array<i64: 8, 128>}]} {
    %c0 = arith.constant 0 : index
    %c0_0 = arith.constant 0 : index
    %0 = vector.load %arg5[%c0, %c0_0] : memref<8x128xf32, #tpu.memory_space<vmem>>, vector<8x128xf32>
    %c0_1 = arith.constant 0 : index
    %c0_2 = arith.constant 0 : index
    %1 = vector.load %arg1[%c0_1, %c0_2] : memref<8x784xbf16, #tpu.memory_space<vmem>>, vector<8x784xbf16>
    %c0_3 = arith.constant 0 : index
    %c0_4 = arith.constant 0 : index
    %2 = vector.load %arg2[%c0_3, %c0_4] : memref<784x128xbf16, #tpu.memory_space<vmem>>, vector<784x128xbf16>
    %cst = arith.constant dense<0.000000e+00> : vector<8x128xf32>
    %3 = tpu.matmul %1, %2, %cst {dimension_numbers = #tpu.dot_dimension_numbers<[1], [0], [0], [1], [0, 0, 1, 1], [], []>} : vector<8x784xbf16>, vector<784x128xbf16>, vector<8x128xf32> -> vector<8x128xf32>
    %4 = vector.extract_strided_slice %0 {offsets = [0, 0], sizes = [1, 128], strides = [1, 1]} : vector<8x128xf32> to vector<1x128xf32>
    %5 = vector.broadcast %4 : vector<1x128xf32> to vector<8x128xf32>
    %6 = arith.addf %3, %5 : vector<8x128xf32>
    %cst_5 = arith.constant 0.000000e+00 : f32
    %7 = vector.broadcast %cst_5 : f32 to vector<8x128xf32>
    %8 = arith.maximumf %6, %7 : vector<8x128xf32>
    %9 = arith.truncf %8 : vector<8x128xf32> to vector<8x128xbf16>
    %c0_6 = arith.constant 0 : index
    %c0_7 = arith.constant 0 : index
    %10 = vector.load %arg3[%c0_6, %c0_7] : memref<128x128xbf16, #tpu.memory_space<vmem>>, vector<128x128xbf16>
    %cst_8 = arith.constant dense<0.000000e+00> : vector<8x128xf32>
    %11 = tpu.matmul %9, %10, %cst_8 {dimension_numbers = #tpu.dot_dimension_numbers<[1], [0], [0], [1], [0, 0, 1, 1], [], []>} : vector<8x128xbf16>, vector<128x128xbf16>, vector<8x128xf32> -> vector<8x128xf32>
    %12 = vector.extract_strided_slice %0 {offsets = [1, 0], sizes = [1, 128], strides = [1, 1]} : vector<8x128xf32> to vector<1x128xf32>
    %13 = vector.broadcast %12 : vector<1x128xf32> to vector<8x128xf32>
    %14 = arith.addf %11, %13 : vector<8x128xf32>
    %cst_9 = arith.constant 0.000000e+00 : f32
    %15 = vector.broadcast %cst_9 : f32 to vector<8x128xf32>
    %16 = arith.maximumf %14, %15 : vector<8x128xf32>
    %17 = vector.extract_strided_slice %0 {offsets = [2, 0], sizes = [1, 128], strides = [1, 1]} : vector<8x128xf32> to vector<1x128xf32>
    %18 = vector.broadcast %17 : vector<1x128xf32> to vector<8x128xf32>
    %19 = arith.addf %16, %18 : vector<8x128xf32>
    %cst_10 = arith.constant 0.000000e+00 : f32
    %20 = vector.broadcast %cst_10 : f32 to vector<8x128xf32>
    %21 = arith.maximumf %19, %20 : vector<8x128xf32>
    %22 = arith.truncf %21 : vector<8x128xf32> to vector<8x128xbf16>
    %c0_11 = arith.constant 0 : index
    %c0_12 = arith.constant 0 : index
    %23 = vector.load %arg4[%c0_11, %c0_12] : memref<128x128xbf16, #tpu.memory_space<vmem>>, vector<128x128xbf16>
    %cst_13 = arith.constant dense<0.000000e+00> : vector<8x128xf32>
    %24 = tpu.matmul %22, %23, %cst_13 {dimension_numbers = #tpu.dot_dimension_numbers<[1], [0], [0], [1], [0, 0, 1, 1], [], []>} : vector<8x128xbf16>, vector<128x128xbf16>, vector<8x128xf32> -> vector<8x128xf32>
    %25 = vector.extract_strided_slice %0 {offsets = [3, 0], sizes = [1, 128], strides = [1, 1]} : vector<8x128xf32> to vector<1x128xf32>
    %26 = vector.broadcast %25 : vector<1x128xf32> to vector<8x128xf32>
    %27 = arith.addf %24, %26 : vector<8x128xf32>
    %28 = arith.truncf %27 : vector<8x128xf32> to vector<8x128xbf16>
    %c0_14 = arith.constant 0 : index
    %c0_15 = arith.constant 0 : index
    %29 = vector.load %arg6[%c0_14, %c0_15] : memref<8x128xbf16, #tpu.memory_space<vmem>>, vector<8x128xbf16>
    tpu.vector_store %arg6[%c0_14, %c0_15], %28 {strides = array<i32>} : memref<8x128xbf16, #tpu.memory_space<vmem>>, vector<8x128xbf16>,
    return
  }
  func.func @transform_0(%arg0: i32) -> (i32, i32) {
    %c0_i32 = arith.constant 0 : i32
    %c0_i32_0 = arith.constant 0 : i32
    return %arg0, %c0_i32 : i32, i32
  }
  func.func @transform_1(%arg0: i32) -> (i32, i32) {
    %c0_i32 = arith.constant 0 : i32
    %c0_i32_0 = arith.constant 0 : i32
    %c0_i32_1 = arith.constant 0 : i32
    return %c0_i32, %c0_i32_0 : i32, i32
  }
  func.func @transform_2(%arg0: i32) -> (i32, i32) {
    %c0_i32 = arith.constant 0 : i32
    %c0_i32_0 = arith.constant 0 : i32
    %c0_i32_1 = arith.constant 0 : i32
    return %c0_i32, %c0_i32_0 : i32, i32
  }
  func.func @transform_3(%arg0: i32) -> (i32, i32) {
    %c0_i32 = arith.constant 0 : i32
    %c0_i32_0 = arith.constant 0 : i32
    %c0_i32_1 = arith.constant 0 : i32
    return %c0_i32, %c0_i32_0 : i32, i32
  }
  func.func @transform_4(%arg0: i32) -> (i32, i32) {
    %c0_i32 = arith.constant 0 : i32
    %c0_i32_0 = arith.constant 0 : i32
    %c0_i32_1 = arith.constant 0 : i32
    return %c0_i32, %c0_i32_0 : i32, i32
  }
  func.func @transform_5(%arg0: i32) -> (i32, i32) {
    %c0_i32 = arith.constant 0 : i32
    %c0_i32_0 = arith.constant 0 : i32
    return %arg0, %c0_i32 : i32, i32
  }
}

</mosaic_0001>

<bundles_post_ra>
// kernel: tpu_custom_call.1
= control target key start
LH: loop header
LB: loop body
LE: loop exit
PB: predicated region body
PF: predicated region fallthrough
CT: control target
= control target key end

     0   :  { %10 = vsyncpa [#allocation3], 0  ;;  %s1447_s0 = inlined_call_operand.hbm [shape: bf16[8,784], index: 0, kind: input, shape index: {}]   ;;  %s1448_s1 = inlined_call_operand.hbm [shape: bf16[784,128], index: 1, kind: input, shape index: {}]   ;;  %s1449_s2 = inlined_call_operand.hbm [shape: bf16[128,128], index: 2, kind: input, shape index: {}]   ;;  %s1450_s3 = inlined_call_operand.hbm [shape: bf16[128,128], index: 3, kind: input, shape index: {}]   ;;  %s1451_s4 = inlined_call_operand.vmem [shape: f32[8,128], index: 4, kind: input, shape index: {}]   ;;  %s1452_s5 = inlined_call_operand.hbm [shape: bf16[8,128], index: 5, kind: output, shape index: {}]  }
   0x1   :  { %11 = vsyncpa [#allocation6], 0 }
   0x2   :  { %12 = vsyncpa [#allocation9], 0 }
   0x3   :  { %13 = vsyncpa [#allocation4], 0  ;;  %s1313_s18 = smov [#allocation5]   ;;  %s1195_s22 = scalar_lea.hbm %s1448_s1, 6272 }
   0x4   :  { %s29_s19 = sshll.u32 %s1313_s18, 4  ;;  %p1196_p0 = scmp.ne.s32.totalorder %s1448_s1, %s1195_s22  ;;  %s30_s19 = int_to_ptr.vmem [resolvable:$true] %s29_s19 }
   0x5   :  { %p1199_p1 = scmp.lt.u32.totalorder %s1195_s22, %s1448_s1 }
   0x7   :  { %p1201_p2 = pnand %p1199_p1, %p1196_p0 }
   0x9   :  { %1204 = shalt.err (!%p1201_p2)
}
   0xa   :  { %s1205_s27 = scalar_lea.vmem %s30_s19, 6272  ;;  %p1210_p4 = scmp.lt.s32.totalorder %s30_s19, %s30_s19 }
   0xb   :  { %p1206_p3 = scmp.ne.s32.totalorder %s30_s19, %s1205_s27  ;;  %p1211_p5 = scmp.lt.s32.totalorder %s1205_s27, %s1205_s27 }
   0xd   :  { %p1212_p6 = por %p1211_p5, %p1210_p4 }
   0xf   :  { %p1213_p7 = pnand %p1212_p6, %p1206_p3 }
  0x11   :  { %1216 = shalt.err (!%p1213_p7)
}
  0x12   :  { %s1314_s28 = smov 64   ;;  %s1315_s29 = smov 4  }
  0x13   :  { %35 = dma.hbm_to_vmem [thread:$0]  %s1448_s1, 6272, %s30_s19, [#allocation6], %s1314_s28, %s1314_s28, %s1315_s29  }
  0x14   :  { %s1316_s7 = smov [#allocation2]   ;;  %s1317_s9 = smov [#allocation7]  }
  0x15   :  { %s20_s8 = sshll.u32 %s1316_s7, 4  ;;  %s41_s10 = sshll.u32 %s1317_s9, 4  ;;  %s21_s8 = int_to_ptr.vmem [resolvable:$true] %s20_s8  ;;  %s42_s10 = int_to_ptr.vmem [resolvable:$true] %s41_s10 }
  0x16   :  { %s1217_s13 = scalar_lea.hbm %s1447_s0, 448 }
  0x17   :  { %p1218_p8 = scmp.ne.s32.totalorder %s1447_s0, %s1217_s13  ;;  %p1221_p9 = scmp.lt.u32.totalorder %s1217_s13, %s1447_s0 }
  0x19   :  { %p1223_p10 = pnand %p1221_p9, %p1218_p8 }
  0x1b   :  { %1226 = shalt.err (!%p1223_p10)
}
  0x1c   :  { %s1227_s1 = scalar_lea.vmem %s21_s8, 448  ;;  %p1232_p12 = scmp.lt.s32.totalorder %s21_s8, %s21_s8 }
  0x1d   :  { %p1228_p11 = scmp.ne.s32.totalorder %s21_s8, %s1227_s1  ;;  %p1233_p13 = scmp.lt.s32.totalorder %s1227_s1, %s1227_s1 }
  0x1f   :  { %p1234_p0 = por %p1233_p13, %p1232_p12 }
  0x21   :  { %p1235_p1 = pnand %p1234_p0, %p1228_p11 }
  0x23   :  { %1238 = shalt.err (!%p1235_p1)
}
  0x24   :  { %23 = dma.hbm_to_vmem [thread:$0]  %s1447_s0, 448, %s21_s8, [#allocation3]  }
  0x25   :  { %s1239_s22 = scalar_lea.hbm %s1449_s2, 1024 }
  0x26   :  { %p1240_p2 = scmp.ne.s32.totalorder %s1449_s2, %s1239_s22  ;;  %p1243_p3 = scmp.lt.u32.totalorder %s1239_s22, %s1449_s2 }
  0x28   :  { %p1245_p4 = pnand %p1243_p3, %p1240_p2 }
  0x2a   :  { %1248 = shalt.err (!%p1245_p4)
}
  0x2b   :  { %s1249_s27 = scalar_lea.vmem %s42_s10, 1024  ;;  %p1254_p6 = scmp.lt.s32.totalorder %s42_s10, %s42_s10 }
  0x2c   :  { %p1250_p5 = scmp.ne.s32.totalorder %s42_s10, %s1249_s27  ;;  %p1255_p7 = scmp.lt.s32.totalorder %s1249_s27, %s1249_s27 }
  0x2e   :  { %p1256_p8 = por %p1255_p7, %p1254_p6 }
  0x30   :  { %p1257_p9 = pnand %p1256_p8, %p1250_p5 }
  0x32   :  { %1260 = shalt.err (!%p1257_p9)
}
  0x33   :  { %47 = dma.hbm_to_vmem [thread:$0]  %s1449_s2, 1024, %s42_s10, [#allocation6], %s1314_s28, %s1314_s28, %s1315_s29  }
  0x34   :  { %s1318_s6 = smov [#allocation8]   ;;  %s1261_s11 = scalar_lea.hbm %s1450_s3, 1024 }
  0x35   :  { %s53_s7 = sshll.u32 %s1318_s6, 4  ;;  %p1262_p10 = scmp.ne.s32.totalorder %s1450_s3, %s1261_s11  ;;  %s54_s7 = int_to_ptr.vmem [resolvable:$true] %s53_s7 }
  0x36   :  { %p1265_p11 = scmp.lt.u32.totalorder %s1261_s11, %s1450_s3 }
  0x38   :  { %p1267_p12 = pnand %p1265_p11, %p1262_p10 }
  0x3a   :  { %1270 = shalt.err (!%p1267_p12)
}
  0x3b   :  { %s1271_s16 = scalar_lea.vmem %s54_s7, 1024  ;;  %p1276_p0 = scmp.lt.s32.totalorder %s54_s7, %s54_s7 }
  0x3c   :  { %p1272_p13 = scmp.ne.s32.totalorder %s54_s7, %s1271_s16  ;;  %p1277_p1 = scmp.lt.s32.totalorder %s1271_s16, %s1271_s16 }
  0x3e   :  { %p1278_p2 = por %p1277_p1, %p1276_p0 }
  0x40   :  { %p1279_p3 = pnand %p1278_p2, %p1272_p13 }
  0x42   :  { %1282 = shalt.err (!%p1279_p3)
}
  0x43   :  { %59 = dma.hbm_to_vmem [thread:$0]  %s1450_s3, 1024, %s54_s7, [#allocation9], %s1314_s28, %s1314_s28, %s1315_s29  }
  0x44   :  { %1305 = dma.done.wait [#allocation3], 448  }
  0x45   :  { %1306 = vsyncadd [#allocation3], 4294966848 }
  0x46   :  { %1307 = dma.done.wait [#allocation6], 7296  }
  0x47   :  { %1308 = vsyncadd [#allocation6], 4294960000 }
  0x48   :  { %1309 = dma.done.wait [#allocation9], 1024  }
  0x49   :  { %1310 = vsyncadd [#allocation9], 4294966272  ;;  %v1123_v0 = vld [vmem:[#allocation5 + $0x40] sm:$0xff]   ;;  %v1127_v4 = vld [vmem:[#allocation5 + $0x48] sm:$0xff]   ;;  %v1319_v43 = vmov 0.0   ;;  %vm1320_vm0 = vmmov 0  }
  0x4a   :  { %v1124_v1 = vld [vmem:[#allocation5] sm:$0xff]   ;;  %982 = vmatprep.subr.bf16.mxu0 %v1123_v0  ;;  %v1128_v5 = vld [vmem:[#allocation5 + $0x8] sm:$0xff]   ;;  %v1131_v8 = vld [vmem:[#allocation5 + $0x50] sm:$0xff]   ;;  %vm500_vm1 = vcmask 130048  }
  0x4b   :  { %v1125_v2 = vld [vmem:[#allocation5 + $0xc0] sm:$0xff]   ;;  %983 = vmatpush3.bf16.msra.mxu0 %v1124_v1  ;;  %v1129_v6 = vld [vmem:[#allocation5 + $0xc8] sm:$0xff]   ;;  %v1132_v9 = vld [vmem:[#allocation5 + $0x10] sm:$0xff]  }
  0x4c   :  { %v1126_v3 = vld [vmem:[#allocation5 + $0x80] sm:$0xff]   ;;  %1004 = vmatprep.subr.bf16.mxu1 %v1125_v2  ;;  %984 = vmatprep.subr.bf16.mxu0 %v1127_v4  ;;  %v1130_v7 = vld [vmem:[#allocation5 + $0x88] sm:$0xff]   ;;  %v1133_v10 = vld [vmem:[#allocation5 + $0xd0] sm:$0xff]  }
  0x4d   :  { %1005 = vmatpush3.bf16.msra.mxu1 %v1126_v3  ;;  %v1134_v11 = vld [vmem:[#allocation5 + $0x90] sm:$0xff]   ;;  %v1135_v12 = vld [vmem:[#allocation5 + $0x58] sm:$0xff]   ;;  %v1139_v16 = vld [vmem:[#allocation5 + $0x60] sm:$0xff]  }
  0x4e   :  { %1006 = vmatprep.subr.bf16.mxu1 %v1129_v6  ;;  %v1136_v13 = vld [vmem:[#allocation5 + $0x18] sm:$0xff]   ;;  %v1140_v17 = vld [vmem:[#allocation5 + $0x20] sm:$0xff]   ;;  %v1143_v20 = vld [vmem:[#allocation5 + $0x68] sm:$0xff]  }
  0x4f   :  { %985 = vmatpush3.bf16.msra.mxu0 %v1128_v5  ;;  %v1137_v14 = vld [vmem:[#allocation5 + $0xd8] sm:$0xff]   ;;  %v1141_v18 = vld [vmem:[#allocation5 + $0xe0] sm:$0xff]   ;;  %v1144_v21 = vld [vmem:[#allocation5 + $0x28] sm:$0xff]  }
  0x50   :  { %986 = vmatprep.subr.bf16.mxu0 %v1131_v8  ;;  %v1138_v15 = vld [vmem:[#allocation5 + $0x98] sm:$0xff]   ;;  %v1142_v19 = vld [vmem:[#allocation5 + $0xa0] sm:$0xff]   ;;  %v1145_v22 = vld [vmem:[#allocation5 + $0xe8] sm:$0xff]  }
  0x51   :  { %1007 = vmatpush3.bf16.msra.mxu1 %v1130_v7  ;;  %v1146_v23 = vld [vmem:[#allocation5 + $0xa8] sm:$0xff]   ;;  %v1147_v24 = vld [vmem:[#allocation5 + $0x70] sm:$0xff]   ;;  %v1151_v28 = vld [vmem:[#allocation5 + $0x78] sm:$0xff]  }
  0x52   :  { %1008 = vmatprep.subr.bf16.mxu1 %v1133_v10  ;;  %v1148_v25 = vld [vmem:[#allocation5 + $0x30] sm:$0xff]   ;;  %v1152_v29 = vld [vmem:[#allocation5 + $0x38] sm:$0xff]   ;;  %v76_v31 = vld [vmem:[#allocation2] sm:$0xff] }
  0x53   :  { %987 = vmatpush3.bf16.msra.mxu0 %v1132_v9  ;;  %v1149_v26 = vld [vmem:[#allocation5 + $0xf0] sm:$0xff]   ;;  %v1153_v30 = vld [vmem:[#allocation5 + $0xf8] sm:$0xff]   ;;  %v909_v32 = vcombine.low %v76_v31, %v76_v31  ;;  %v910_v33 = vcombine.high %v76_v31, %v76_v31  ;;  %v1157_v35 = vld [vmem:[#allocation5 + $0x140] sm:$0xff]   ;;  %v178_v9 = vlaneseq }
  0x54   :  { %988 = vmatprep.subr.bf16.mxu0 %v1135_v12  ;;  %v1150_v27 = vld [vmem:[#allocation5 + $0xb0] sm:$0xff]   ;;  %v1156_v34 = vld [vmem:[#allocation5 + $0xb8] sm:$0xff]   ;;  %v1160_v39 = vld [vmem:[#allocation5 + $0x100] sm:$0xff]  }
  0x55   :  { %1009 = vmatpush3.bf16.msra.mxu1 %v1134_v11  ;;  %v77_v36 = vld [vmem:[#allocation2 + $0x8] sm:$0xff]  ;;  %536 = vmatprep.mubr.bf16.mxu0 %v910_v33  ;;  %v1165_v45 = vld [vmem:[#allocation5 + $0x158] sm:$0xff]   ;;  %v1167_v47 = vld [vmem:[#allocation5 + $0x160] sm:$0xff]   ;;  %v179_v10 = vshrl.u32 %v178_v9, 7 }
  0x56   :  { %1010 = vmatprep.subr.bf16.mxu1 %v1137_v14  ;;  %v911_v37 = vcombine.low %v77_v36, %v77_v36  ;;  %v912_v38 = vcombine.high %v77_v36, %v77_v36  ;;  %v1161_v40 = vld [vmem:[#allocation5 + $0x148] sm:$0xff]   ;;  %v1163_v42 = vld [vmem:[#allocation5 + $0x150] sm:$0xff]   ;;  %v1166_v46 = vld [vmem:[#allocation5 + $0x118] sm:$0xff]  }
  0x57   :  { %989 = vmatpush3.bf16.msra.mxu0 %v1136_v13  ;;  %v1162_v41 = vld [vmem:[#allocation5 + $0x108] sm:$0xff]   ;;  %v1164_v44 = vld [vmem:[#allocation5 + $0x110] sm:$0xff]   ;;  %v1168_v48 = vld [vmem:[#allocation5 + $0x120] sm:$0xff]   ;;  %v180_v11 = vsub.s32 0, %v179_v10 }
  0x58   :  { %990 = vmatprep.subr.bf16.mxu0 %v1139_v16  ;;  %576 = vmatprep.mubr.bf16.mxu1 %v912_v38  ;;  %v1169_v49 = vld [vmem:[#allocation5 + $0x168] sm:$0xff]   ;;  %v1175_v50 = vld [vmem:[#allocation5 + $0x180] sm:$0xff]   ;;  %v78_v51 = vld [vmem:[#allocation2 + $0x10] sm:$0xff] }
  0x59   :  { %1011 = vmatpush3.bf16.msra.mxu1 %v1138_v15  ;;  %v1170_v52 = vld [vmem:[#allocation5 + $0x128] sm:$0xff]   ;;  %v914_v53 = vcombine.high %v78_v51, %v78_v51  ;;  %v1178_v54 = vld [vmem:[#allocation2 + $0x18] ss:$0 sps:$4 sm:$0xff]   ;;  %v1171_v55 = vld [vmem:[#allocation5 + $0x170] sm:$0xff]   ;;  %v913_v59 = vcombine.low %v78_v51, %v78_v51 }
  0x5a   :  { %1012 = vmatprep.subr.bf16.mxu1 %v1141_v18  ;;  %v1172_v56 = vld [vmem:[#allocation5 + $0x130] sm:$0xff]   ;;  %v1173_v57 = vld [vmem:[#allocation5 + $0x178] sm:$0xff]   ;;  %v1179_v60 = vld [vmem:[#allocation7] sm:$0xff]  }
  0x5b   :  { %991 = vmatpush3.bf16.msra.mxu0 %v1140_v17  ;;  %v1174_v58 = vld [vmem:[#allocation5 + $0x138] sm:$0xff]   ;;  %v1180_v61 = vld [vmem:[#allocation7 + $0x8] sm:$0xff]   ;;  %v1182_v63 = vld [vmem:[#allocation7 + $0x18] sm:$0xff]  }
  0x5c   :  { %992 = vmatprep.subr.bf16.mxu0 %v1143_v20  ;;  %v1181_v62 = vld [vmem:[#allocation7 + $0x10] sm:$0xff]   ;;  %v1183_v0 = vld [vmem:[#allocation7 + $0x20] sm:$0xff]   ;;  %v1184_v1 = vld [vmem:[#allocation7 + $0x28] sm:$0xff]  }
  0x5d   :  { %1013 = vmatpush3.bf16.msra.mxu1 %v1142_v19  ;;  %v1185_v2 = vld [vmem:[#allocation7 + $0x30] sm:$0xff]   ;;  %v1186_v3 = vld [vmem:[#allocation7 + $0x38] sm:$0xff]   ;;  %v1187_v4 = vld [vmem:[#allocation8] sm:$0xff]  }
  0x5e   :  { %1014 = vmatprep.subr.bf16.mxu1 %v1145_v22  ;;  %v1188_v5 = vld [vmem:[#allocation8 + $0x8] sm:$0xff]   ;;  %v1189_v6 = vld [vmem:[#allocation8 + $0x10] sm:$0xff]   ;;  %v1190_v7 = vld [vmem:[#allocation8 + $0x18] sm:$0xff]  }
  0x5f   :  { %993 = vmatpush3.bf16.msra.mxu0 %v1144_v21  ;;  %v1191_v8 = vld [vmem:[#allocation8 + $0x20] sm:$0xff]  }
  0x60   :  { %994 = vmatprep.subr.bf16.mxu0 %v1147_v24  ;;  %v75_v12 = vld [vmem:[%s1451_s4] sm:$0xff]  ;;  %s1321_s4 = smov [#allocation10]  }
  0x61   :  { %1015 = vmatpush3.bf16.msra.mxu1 %v1146_v23  ;;  %v181_v14 = vrot.slane %v75_v12, %v180_v11  ;;  %s898_s29 = sshll.u32 %s1321_s4, 4  ;;  %s899_s29 = int_to_ptr.vmem [resolvable:$true] %s898_s29 }
  0x62   :  { %1016 = vmatprep.subr.bf16.mxu1 %v1149_v26  ;;  %s1283_s17 = scalar_lea.vmem %s899_s29, 64  ;;  %p1288_p5 = scmp.lt.s32.totalorder %s899_s29, %s899_s29 }
  0x63   :  { %995 = vmatpush3.bf16.msra.mxu0 %v1148_v25  ;;  %p1284_p4 = scmp.ne.s32.totalorder %s899_s29, %s1283_s17  ;;  %p1289_p6 = scmp.lt.s32.totalorder %s1283_s17, %s1283_s17 }
  0x64   :  { %996 = vmatprep.subr.bf16.mxu0 %v1151_v28 }
  0x65   :  { %1017 = vmatpush3.bf16.msra.mxu1 %v1150_v27  ;;  %p1290_p7 = por %p1289_p6, %p1288_p5 }
  0x66   :  { %1018 = vmatprep.subr.bf16.mxu1 %v1153_v30 }
  0x67   :  { %997 = vmatpush3.bf16.msra.mxu0 %v1152_v29  ;;  %p1291_p8 = pnand %p1290_p7, %p1284_p4 }
  0x68   :  { %1026 = vmatprep.subr.bf16.mxu0 %v1157_v35 }
  0x69   :  { %1019 = vmatpush3.bf16.msra.mxu1 %v1156_v34 }
  0x6a   :  { %537 = vmatmul.mubr.bf16.vlgmr.msra.gmra.mrb[0].mxu0 %v909_v32  ;;  %1068 = vmatprep.subr.bf16.mxu1 %v1319_v43 }
  0x6b   :  { %1027 = vmatpush3.bf16.msra.mxu0 %v1160_v39  ;;  %616 = vmatprep.mubr.bf16.mxu0 %v914_v53  ;;  %v1192_v39 = vld [vmem:[#allocation8 + $0x28] sm:$0xff]  }
  0x6c   :  { %577 = vmatmul.mubr.bf16.vlgmr.msra.gmra.mrb[0].mxu1 %v911_v37  ;;  %1028 = vmatprep.subr.bf16.mxu0 %v1161_v40  ;;  %v1193_v40 = vld [vmem:[#allocation8 + $0x30] sm:$0xff]  }
  0x6d   :  { %1070 = vmatprep.mubr.msk.bf16.mxu1 %vm1320_vm0, %v1319_v43  ;;  %1069 = vmatpush3.bf16.msra.mxu1 %v1175_v50 }
  0x6e   :  { %1074 = vmatprep.subr.bf16.mxu1 %v1319_v43 }
  0x6f   :  { %1029 = vmatpush3.bf16.msra.mxu0 %v1162_v41  ;;  %v1194_v41 = vld [vmem:[#allocation8 + $0x38] sm:$0xff]  }
  0x70   :  { %1030 = vmatprep.subr.bf16.mxu0 %v1163_v42  ;;  %v684_v42 = vsub.s32 1, %v179_v10 }
  0x73   :  { %1031 = vmatpush3.bf16.msra.mxu0 %v1164_v44  ;;  %v685_v44 = vrot.slane %v75_v12, %v684_v42 }
  0x74   :  { %1032 = vmatprep.subr.bf16.mxu0 %v1165_v45  ;;  %1071 = vmatmul.mubr.msk.bf16.vlgmr.msra.gmra.mrb[4].mxu1 %vm500_vm1, %v1178_v54  ;;  %v777_v45 = vsub.s32 2, %v179_v10 }
  0x75   :  { %1090 = vmatprep.mubr.msk.bf16.mxu1 %vm1320_vm0, %v1319_v43  ;;  %1075 = vmatpush3.bf16.msra.mxu1 %v1179_v60 }
  0x76   :  { %1076 = vmatprep.subr.bf16.mxu1 %v1319_v43 }
  0x77   :  { %1033 = vmatpush3.bf16.msra.mxu0 %v1166_v46 }
  0x78   :  { %1034 = vmatprep.subr.bf16.mxu0 %v1167_v47 }
  0x79   :  { %1077 = vmatpush3.bf16.msra.mxu1 %v1180_v61 }
  0x7a   :  { %1078 = vmatprep.subr.bf16.mxu1 %v1319_v43 }
  0x7b   :  { %1035 = vmatpush3.bf16.msra.mxu0 %v1168_v48  ;;  %v778_v48 = vrot.slane %v75_v12, %v777_v45 }
  0x7c   :  { %1036 = vmatprep.subr.bf16.mxu0 %v1169_v49 }
  0x7d   :  { %1079 = vmatpush3.bf16.msra.mxu1 %v1181_v62 }
  0x7e   :  { %1080 = vmatprep.subr.bf16.mxu1 %v1319_v43 }
  0x7f   :  { %1037 = vmatpush3.bf16.msra.mxu0 %v1170_v52 }
  0x80   :  { %1038 = vmatprep.subr.bf16.mxu0 %v1171_v55 }
  0x81   :  { %1081 = vmatpush3.bf16.msra.mxu1 %v1182_v63 }
  0x82   :  { %1082 = vmatprep.subr.bf16.mxu1 %v1319_v43 }
  0x83   :  { %1039 = vmatpush3.bf16.msra.mxu0 %v1172_v56  ;;  %v800_v56 = vsub.s32 3, %v179_v10 }
  0x84   :  { %1040 = vmatprep.subr.bf16.mxu0 %v1173_v57 }
  0x85   :  { %1083 = vmatpush3.bf16.msra.mxu1 %v1183_v0  ;;  %v801_v57 = vrot.slane %v75_v12, %v800_v56 }
  0x86   :  { %1084 = vmatprep.subr.bf16.mxu1 %v1319_v43 }
  0x87   :  { %1041 = vmatpush3.bf16.msra.mxu0 %v1174_v58 }
  0x88   :  { %1094 = vmatprep.subr.bf16.mxu0 %v1319_v43 }
  0x89   :  { %1085 = vmatpush3.bf16.msra.mxu1 %v1184_v1 }
  0x8a   :  { %617 = vmatmul.mubr.bf16.vlgmr.msra.gmra.mrb[4].mxu0 %v913_v59  ;;  %1086 = vmatprep.subr.bf16.mxu1 %v1319_v43 }
  0x8b   :  { %1110 = vmatprep.mubr.msk.bf16.mxu0 %vm1320_vm0, %v1319_v43  ;;  %1095 = vmatpush3.bf16.msra.mxu0 %v1187_v4 }
  0x8c   :  { %1096 = vmatprep.subr.bf16.mxu0 %v1319_v43 }
  0x8d   :  { %1087 = vmatpush3.bf16.msra.mxu1 %v1185_v2 }
  0x8e   :  { %1088 = vmatprep.subr.bf16.mxu1 %v1319_v43 }
  0x8f   :  { %1097 = vmatpush3.bf16.msra.mxu0 %v1188_v5 }
  0x90   :  { %1098 = vmatprep.subr.bf16.mxu0 %v1319_v43 }
  0x91   :  { %1089 = vmatpush3.bf16.msra.mxu1 %v1186_v3 }
  0x93   :  { %1099 = vmatpush3.bf16.msra.mxu0 %v1189_v6 }
  0x94   :  { %1100 = vmatprep.subr.bf16.mxu0 %v1319_v43 }
  0x97   :  { %1101 = vmatpush3.bf16.msra.mxu0 %v1190_v7 }
  0x98   :  { %1102 = vmatprep.subr.bf16.mxu0 %v1319_v43 }
  0x9b   :  { %1103 = vmatpush3.bf16.msra.mxu0 %v1191_v8 }
  0x9c   :  { %1104 = vmatprep.subr.bf16.mxu0 %v1319_v43 }
  0x9f   :  { %1105 = vmatpush3.bf16.msra.mxu0 %v1192_v39 }
  0xa0   :  { %1106 = vmatprep.subr.bf16.mxu0 %v1319_v43 }
  0xa3   :  { %1107 = vmatpush3.bf16.msra.mxu0 %v1193_v40 }
  0xa4   :  { %1108 = vmatprep.subr.bf16.mxu0 %v1319_v43 }
  0xa7   :  { %1109 = vmatpush3.bf16.msra.mxu0 %v1194_v41 }
 0x13d   :  { %v998_v13 = vpop.f32.mrb[0].mxu0 }
 0x13e   :  { %v999_v15 = vpop.f32.mrb[1].mxu0 }
 0x13f   :  { %v1000_v16 = vadd.f32 %v999_v15, %v998_v13  ;;  %v1001_v17 = vpop.f32.mrb[2].mxu0  ;;  %v1020_v18 = vpop.f32.mrb[0].mxu1 }
 0x140   :  { %v1002_v19 = vpop.f32.mrb[3].mxu0  ;;  %v1021_v20 = vpop.f32.mrb[1].mxu1 }
 0x141   :  { %v539_v21 = vadd.f32 %v1000_v16, %v181_v14  ;;  %v1022_v22 = vadd.f32 %v1021_v20, %v1020_v18  ;;  %v1023_v23 = vpop.f32.mrb[2].mxu1 }
 0x142   :  { %v1024_v24 = vpop.f32.mrb[3].mxu1 }
 0x143   :  { %v579_v25 = vadd.f32 %v1022_v22, %v539_v21 }
 0x147   :  { %v658_v26 = vpop.f32.mrb[4].mxu1 }
 0x148   :  { %v1072_v27 = vpop.f32.mrb[5].mxu1 }
 0x149   :  { %v661_v28 = vpop.f32.mrb[6].mxu1 }
 0x14a   :  { %v1073_v29 = vpop.f32.mrb[7].mxu1 }
 0x15d   :  { %v1042_v30 = vpop.f32.mrb[4].mxu0 }
 0x15e   :  { %v1043_v31 = vpop.f32.mrb[5].mxu0 }
 0x15f   :  { %v1044_v32 = vadd.f32 %v1043_v31, %v1042_v30  ;;  %v1045_v33 = vpop.f32.mrb[6].mxu0 }
 0x160   :  { %v1046_v34 = vpop.f32.mrb[7].mxu0 }
 0x161   :  { %v619_v35 = vadd.f32 %v1044_v32, %v579_v25 }
 0x163   :  { %v659_v36 = vadd.f32 %v658_v26, %v619_v35 }
 0x165   :  { %v664_v37 = vmax.f32 %v659_v36, 0.0 }
 0x167   :  { %v665_v38 = vpack.c.bf16 %v664_v37, %v664_v37 }
 0x169   :  { %1091 = vmatmul.mubr.bf16.vlgmr.msra.gmra.mrb[8].mxu1 %v665_v38 }
 0x23c   :  { %v768_v46 = vpop.f32.mrb[8].mxu1 }
 0x23d   :  { %v769_v47 = vadd.f32 %v768_v46, %v685_v44  ;;  %v1092_v49 = vpop.f32.mrb[9].mxu1 }
 0x23e   :  { %v771_v50 = vpop.f32.mrb[10].mxu1 }
 0x23f   :  { %v774_v51 = vmax.f32 %v769_v47, 0.0  ;;  %v1093_v52 = vpop.f32.mrb[11].mxu1 }
 0x241   :  { %v779_v53 = vadd.f32 %v778_v48, %v774_v51 }
 0x243   :  { %v780_v54 = vmax.f32 %v779_v53, 0.0 }
 0x245   :  { %v781_v55 = vpack.c.bf16 %v780_v54, %v780_v54 }
 0x247   :  { %1111 = vmatmul.mubr.bf16.vlgmr.msra.gmra.mrb[8].mxu0 %v781_v55 }
 0x31a   :  { %v884_v58 = vpop.f32.mrb[8].mxu0 }
 0x31b   :  { %v885_v43 = vadd.f32 %v884_v58, %v801_v57  ;;  %v1112_v59 = vpop.f32.mrb[9].mxu0 }
 0x31c   :  { %v887_v60 = vpop.f32.mrb[10].mxu0 }
 0x31d   :  { %v890_v61 = vpack.c.bf16 %v885_v43, %v885_v43  ;;  %v1113_v62 = vpop.f32.mrb[11].mxu0 }
 0x31f   :  { %891 = vst [vmem:[#allocation10] sm:$0xf] %v890_v61 }
 0x320   :  { %1294 = shalt.err (!%p1291_p8)
}
 0x321   :  { %s1295_s19 = scalar_lea.hbm %s1452_s5, 64 }
 0x322   :  { %p1296_p9 = scmp.ne.s32.totalorder %s1452_s5, %s1295_s19  ;;  %p1299_p10 = scmp.lt.u32.totalorder %s1295_s19, %s1452_s5 }
 0x324   :  { %p1301_p11 = pnand %p1299_p10, %p1296_p9 }
 0x326   :  { %1304 = shalt.err (!%p1301_p11)
}
 0x327   :  { %901 = dma.vmem_to_hbm [thread:$0]  %s899_s29, 64, %s1452_s5, [#allocation4]  }
 0x328   :  { %1311 = dma.done.wait [#allocation4], 64  }
 0x329   :  { %1312 = vsyncadd [#allocation4], 4294967232 }
 0x32a   :  { %905 = vsyncpa [#allocation3], 1 }
 0x32b   :  { %906 = vsyncpa [#allocation6], 1 }
 0x32c   :  { %907 = vsyncpa [#allocation9], 1 }
 0x32d   :  { %908 = vsyncpa [#allocation4], 1 }

</bundles_post_ra>
